<compile_context>
chip_gen: v7x
topology: tpu7x:2x2x1
jax: 0.10.0
libtpu: 0.0.40
codegen_flags: <defaults>
</compile_context>

<pallas_src>
import functools

import jax
import jax.numpy as jnp
import numpy as np
from jax.experimental import pallas as pl
from jax.experimental.pallas import tpu as pltpu


# ----------------------------- kernel body ---------------------------------


def _gln_kernel(x_ref, mmean_ref, mv_ref, mt_ref, o_ref, *, eps, fuse_mean,
                b_blk):
    # x_ref:     (B_blk, C, T_blk)   current (batch-block, time-tile)
    # mmean_ref: (C, C) fused projector P  -or-  (G, C) mean reduction Mn
    # mv_ref:    (G, C) unbiased-variance reduction matrix
    # mt_ref:    (C, G) group -> channel gather matrix
    mmean = mmean_ref[...]
    mv = mv_ref[...]
    mt = mt_ref[...]

    for b in range(b_blk):  # static unroll over batch rows in this block
        x = x_ref[b].astype(jnp.float32)                               # (C, T)

        if fuse_mean:
            emean = jnp.dot(mmean, x,
                            preferred_element_type=jnp.float32)        # (C, T)
        else:
            gmean = jnp.dot(mmean, x,
                            preferred_element_type=jnp.float32)        # (G, T)
            emean = jnp.dot(mt, gmean,
                            preferred_element_type=jnp.float32)        # (C, T)

        dev = x - emean                                                # (C, T)
        gvar = jnp.dot(mv, dev * dev,
                       preferred_element_type=jnp.float32)             # (G, T)
        # exact divide at group granularity (tiny), then gather to channels
        inv_g = 1.0 / (jnp.sqrt(gvar) + eps)                           # (G, T)
        einv = jnp.dot(mt, inv_g,
                       preferred_element_type=jnp.float32)             # (C, T)

        o_ref[b] = (dev * einv).astype(o_ref.dtype)


# ----------------------------- tiling heuristics ----------------------------


def _round_down_128(n):
    return (n // 128) * 128


def _choose_t_blk(T, C, target_elems, t_blk_cap):
    if T <= 128:
        return int(T)  # full dim is always a legal (and tiny) block
    t = max(128, _round_down_128(target_elems // max(C, 1)))
    t = min(t, t_blk_cap, _round_down_128(T))
    return int(max(t, 128))


def _choose_b_blk(B, C, T_blk, target_elems, num_t_tiles):
    per_b = max(C * T_blk, 1)
    max_b = int(max(1, min(B, target_elems // per_b, 8)))
    divisors = [d for d in range(1, B + 1) if B % d == 0]
    cands = [d for d in divisors if d <= max_b]
    b_blk = cands[-1] if cands else 1
    # prefer >= 2 total grid steps (v7x has 2 TensorCores per chip)
    while b_blk > 1 and (B // b_blk) * num_t_tiles < 2:
        smaller = [d for d in divisors if d < b_blk]
        b_blk = smaller[-1] if smaller else 1
    return b_blk


def _vmem_capacity_bytes():
    try:
        return int(pltpu.get_tpu_info().vmem_capacity_bytes)
    except Exception:
        return 64 << 20  # conservative (v7x-sized) fallback


# ----------------------------- factory / wrapper ----------------------------


@functools.lru_cache(maxsize=None)
def _build_group_layer_norm(cg_tuple, eps):
    cg = np.asarray(cg_tuple, dtype=np.int64)
    C = int(cg.shape[0])
    G = int(cg.max()) + 1

    onehot = (np.arange(G)[:, None] == cg[None, :]).astype(np.float32)  # (G, C)
    count = onehot.sum(axis=1, keepdims=True)                           # (G, 1)
    Mn = onehot / np.maximum(count, 1.0)                                # (G, C)
    Mv = onehot / np.maximum(count - 1.0, 1.0)                          # (G, C)
    Mt = np.ascontiguousarray(onehot.T)                                 # (C, G)

    # Fused (C,C) mean projector only when the extra MXU work is negligible on
    # every generation (v5e f32 matmul throughput is the binding constraint).
    fuse_mean = (C <= 128) or (C <= 256 and C <= 8 * G)
    Mmean = (Mt @ Mn).astype(np.float32) if fuse_mean else Mn

    mmean_d = jnp.asarray(Mmean)
    mv_d = jnp.asarray(Mv)
    mt_d = jnp.asarray(Mt)
    mat_bytes = 4 * (Mmean.size + Mv.size + Mt.size)

    vmem_cap = _vmem_capacity_bytes()
    big_vmem = vmem_cap > (64 << 20)            # v5e / v6e (128 MiB) vs v7x
    target_elems = (1 << 20) if big_vmem else (512 * 1024)  # elems / input blk
    t_blk_cap = 4096 if big_vmem else 2048

    @jax.jit
    def run(x):
        B, Cx, T, last = x.shape
        assert last == 1, "expects trailing singleton dim (x.squeeze(-1))"
        assert Cx == C, "channel_groups length must match x.shape[1]"

        x3 = x.reshape(B, C, T)
        in_bytes = x.dtype.itemsize

        T_blk = _choose_t_blk(T, C, target_elems, t_blk_cap)
        num_t = pl.cdiv(T, T_blk)
        # if a single batch would leave one v7x core idle, split T further
        if B == 1 and num_t == 1 and T >= 256:
            T_blk = max(128, _round_down_128(T // 2))
            num_t = pl.cdiv(T, T_blk)
        B_blk = _choose_b_blk(B, C, T_blk, target_elems, num_t)
        grid = (B // B_blk, num_t)

        # explicit VMEM budget (double-buffered I/O blocks, resident matrices,
        # f32 intermediates), capped at 75% of this generation's capacity
        blk_io = B_blk * C * T_blk * in_bytes
        need = (4 * blk_io              # in + out, double-buffered
                + 2 * mat_bytes         # resident membership matrices (x2 buf)
                + 8 * C * T_blk * 4     # f32 intermediates per batch row
                + (2 << 20))            # headroom / compiler scratch
        vmem_limit = int(min(max(need, 32 << 20), (3 * vmem_cap) // 4))

        kernel = functools.partial(_gln_kernel, eps=float(eps),
                                   fuse_mean=fuse_mean, b_blk=B_blk)

        cost = pl.CostEstimate(
            flops=int(2 * B * T * ((C * C if fuse_mean else 2 * G * C)
                                   + G * C + C * G) + 4 * B * C * T),
            transcendentals=int(2 * B * G * T),
            bytes_accessed=int(2 * B * C * T * in_bytes + mat_bytes),
        )

        out = pl.pallas_call(
            kernel,
            out_shape=jax.ShapeDtypeStruct((B, C, T), x.dtype),
            grid_spec=pltpu.PrefetchScalarGridSpec(
                num_scalar_prefetch=0,
                grid=grid,
                in_specs=[
                    pl.BlockSpec((B_blk, C, T_blk), lambda b, t: (b, 0, t)),
                    pl.BlockSpec(tuple(int(d) for d in Mmean.shape),
                                 lambda b, t: (0, 0)),
                    pl.BlockSpec((G, C), lambda b, t: (0, 0)),
                    pl.BlockSpec((C, G), lambda b, t: (0, 0)),
                ],
                out_specs=pl.BlockSpec((B_blk, C, T_blk),
                                       lambda b, t: (b, 0, t)),
            ),
            compiler_params=pltpu.CompilerParams(
                dimension_semantics=("parallel", "parallel"),
                vmem_limit_bytes=vmem_limit),
            cost_estimate=cost,
        )(x3, mmean_d, mv_d, mt_d)

        return out.reshape(B, C, T, 1)

    return run


def group_layer_norm(x, channel_groups, eps=1e-4):
    """x: (B, C, T, 1); channel_groups: static length-C sequence of group ids."""
    fn = _build_group_layer_norm(tuple(int(g) for g in channel_groups),
                                 float(eps))
    return fn(x)


# ----------------------------- reference & test -----------------------------


def _reference(x, channel_groups, eps=1e-4):
    # pure-JAX reference mirroring torch_scatter scatter_mean / scatter_std
    xs = x[..., 0]                                           # (B, C, T)
    cg = np.asarray(channel_groups, dtype=np.int64)
    G = int(cg.max()) + 1
    onehot = jnp.asarray(
        (np.arange(G)[:, None] == cg[None, :]).astype(np.float32))      # (G, C)
    count = onehot.sum(axis=1)                               # (G,)
    gsum = jnp.einsum("gc,bct->bgt", onehot, xs)
    gmean = gsum / jnp.maximum(count, 1.0)[None, :, None]
    emean = gmean[:, cg, :]                                  # (B, C, T)
    dev = xs - emean
    gvar = jnp.einsum("gc,bct->bgt", onehot, dev * dev)
    gstd = jnp.sqrt(gvar / jnp.maximum(count - 1.0, 1.0)[None, :, None])
    estd = gstd[:, cg, :]
    out = (xs - emean) / (estd + eps)
    return out[..., None]


if __name__ == "__main__":
    key = jax.random.PRNGKey(0)
    B, C, T = 2, 6, 16
    channel_groups = [0, 0, 1, 1, 2, 2]   # 3 groups, 2 channels each
    x = jax.random.normal(key, (B, C, T, 1), dtype=jnp.float32)

    out = group_layer_norm(x, channel_groups, eps=1e-4)
    out = jax.block_until_ready(out)

    ref = _reference(x, channel_groups, eps=1e-4)
    assert out.shape == x.shape
    assert jnp.allclose(out, ref, atol=1e-4, rtol=1e-4), "mismatch vs reference"

    print("KERNEL_OK")
</pallas_src>

<mosaic_0001>
module attributes {stable_mosaic.version = 11 : i64} {
  func.func @_gln_kernel(%arg0: i32, %arg1: i32, %arg2: memref<1x6x16xf32, #tpu.memory_space<vmem>>, %arg3: memref<6x6xf32, #tpu.memory_space<vmem>>, %arg4: memref<3x6xf32, #tpu.memory_space<vmem>>, %arg5: memref<6x3xf32, #tpu.memory_space<vmem>>, %arg6: memref<1x6x16xf32, #tpu.memory_space<vmem>>) attributes {dimension_semantics = [#tpu.dimension_semantics<parallel>, #tpu.dimension_semantics<parallel>], iteration_bounds = array<i64: 2, 1>, scalar_prefetch = 0 : i64, scratch_operands = 0 : i64, tpu.core_type = #tpu.core_type<tc>, window_params = [{transform_indices = @transform_0, window_bounds = array<i64: 1, 6, 16>}, {pipeline_mode = #tpu.pipeline_mode<synchronous>, transform_indices = @transform_1, window_bounds = array<i64: 6, 6>}, {pipeline_mode = #tpu.pipeline_mode<synchronous>, transform_indices = @transform_2, window_bounds = array<i64: 3, 6>}, {pipeline_mode = #tpu.pipeline_mode<synchronous>, transform_indices = @transform_3, window_bounds = array<i64: 6, 3>}, {transform_indices = @transform_4, window_bounds = array<i64: 1, 6, 16>}]} {
    %c0 = arith.constant 0 : index
    %c0_0 = arith.constant 0 : index
    %0 = vector.load %arg3[%c0, %c0_0] : memref<6x6xf32, #tpu.memory_space<vmem>>, vector<6x6xf32>
    %c0_1 = arith.constant 0 : index
    %c0_2 = arith.constant 0 : index
    %1 = vector.load %arg4[%c0_1, %c0_2] : memref<3x6xf32, #tpu.memory_space<vmem>>, vector<3x6xf32>
    %c0_3 = arith.constant 0 : index
    %c0_4 = arith.constant 0 : index
    %2 = vector.load %arg5[%c0_3, %c0_4] : memref<6x3xf32, #tpu.memory_space<vmem>>, vector<6x3xf32>
    %c0_5 = arith.constant 0 : index
    %c0_6 = arith.constant 0 : index
    %c0_7 = arith.constant 0 : index
    %3 = vector.load %arg2[%c0_5, %c0_6, %c0_7] : memref<1x6x16xf32, #tpu.memory_space<vmem>>, vector<1x6x16xf32>
    %4 = vector.shape_cast %3 : vector<1x6x16xf32> to vector<6x16xf32>
    %cst = arith.constant dense<0.000000e+00> : vector<6x16xf32>
    %5 = tpu.matmul %0, %4, %cst {dimension_numbers = #tpu.dot_dimension_numbers<[1], [0], [0], [1], [0, 0, 1, 1], [], []>} : vector<6x6xf32>, vector<6x16xf32>, vector<6x16xf32> -> vector<6x16xf32>
    %6 = arith.subf %4, %5 : vector<6x16xf32>
    %7 = arith.mulf %6, %6 : vector<6x16xf32>
    %cst_8 = arith.constant dense<0.000000e+00> : vector<3x16xf32>
    %8 = tpu.matmul %1, %7, %cst_8 {dimension_numbers = #tpu.dot_dimension_numbers<[1], [0], [0], [1], [0, 0, 1, 1], [], []>} : vector<3x6xf32>, vector<6x16xf32>, vector<3x16xf32> -> vector<3x16xf32>
    %9 = math.sqrt %8 : vector<3x16xf32>
    %cst_9 = arith.constant 9.99999974E-5 : f32
    %10 = vector.broadcast %cst_9 : f32 to vector<3x16xf32>
    %11 = arith.addf %9, %10 : vector<3x16xf32>
    %cst_10 = arith.constant 1.000000e+00 : f32
    %12 = vector.broadcast %cst_10 : f32 to vector<3x16xf32>
    %13 = arith.divf %12, %11 : vector<3x16xf32>
    %cst_11 = arith.constant dense<0.000000e+00> : vector<6x16xf32>
    %14 = tpu.matmul %2, %13, %cst_11 {dimension_numbers = #tpu.dot_dimension_numbers<[1], [0], [0], [1], [0, 0, 1, 1], [], []>} : vector<6x3xf32>, vector<3x16xf32>, vector<6x16xf32> -> vector<6x16xf32>
    %15 = arith.mulf %6, %14 : vector<6x16xf32>
    %c0_12 = arith.constant 0 : index
    %c0_13 = arith.constant 0 : index
    %c0_14 = arith.constant 0 : index
    %16 = vector.load %arg6[%c0_12, %c0_13, %c0_14] : memref<1x6x16xf32, #tpu.memory_space<vmem>>, vector<1x6x16xf32>
    %17 = vector.shape_cast %16 : vector<1x6x16xf32> to vector<6x16xf32>
    %18 = vector.shape_cast %15 : vector<6x16xf32> to vector<1x6x16xf32>
    tpu.vector_store %arg6[%c0_12, %c0_13, %c0_14], %18 {strides = array<i32>} : memref<1x6x16xf32, #tpu.memory_space<vmem>>, vector<1x6x16xf32>,
    return
  }
  func.func @transform_0(%arg0: i32, %arg1: i32) -> (i32, i32, i32) {
    %c0_i32 = arith.constant 0 : i32
    %c0_i32_0 = arith.constant 0 : i32
    return %arg0, %c0_i32, %arg1 : i32, i32, i32
  }
  func.func @transform_1(%arg0: i32, %arg1: i32) -> (i32, i32) {
    %c0_i32 = arith.constant 0 : i32
    %c0_i32_0 = arith.constant 0 : i32
    %c0_i32_1 = arith.constant 0 : i32
    return %c0_i32, %c0_i32_0 : i32, i32
  }
  func.func @transform_2(%arg0: i32, %arg1: i32) -> (i32, i32) {
    %c0_i32 = arith.constant 0 : i32
    %c0_i32_0 = arith.constant 0 : i32
    %c0_i32_1 = arith.constant 0 : i32
    return %c0_i32, %c0_i32_0 : i32, i32
  }
  func.func @transform_3(%arg0: i32, %arg1: i32) -> (i32, i32) {
    %c0_i32 = arith.constant 0 : i32
    %c0_i32_0 = arith.constant 0 : i32
    %c0_i32_1 = arith.constant 0 : i32
    return %c0_i32, %c0_i32_0 : i32, i32
  }
  func.func @transform_4(%arg0: i32, %arg1: i32) -> (i32, i32, i32) {
    %c0_i32 = arith.constant 0 : i32
    %c0_i32_0 = arith.constant 0 : i32
    return %arg0, %c0_i32, %arg1 : i32, i32, i32
  }
}

</mosaic_0001>

<bundles_post_ra>
// kernel: run.1
= control target key start
LH: loop header
LB: loop body
LE: loop exit
PB: predicated region body
PF: predicated region fallthrough
CT: control target
= control target key end

     0   :  { %s666_s15 = smov 0   ;;  %s668_s16 = smov 0   ;;  %s715_s0 = inlined_call_operand.vmem [shape: f32[2,6,16], index: 0, kind: input, shape index: {}]   ;;  %s716_s1 = inlined_call_operand.vmem [shape: f32[6,6], index: 1, kind: input, shape index: {}]   ;;  %s717_s2 = inlined_call_operand.vmem [shape: f32[3,6], index: 2, kind: input, shape index: {}]   ;;  %s718_s3 = inlined_call_operand.vmem [shape: f32[6,3], index: 3, kind: input, shape index: {}]   ;;  %s719_s4 = inlined_call_operand.vmem [shape: f32[2,6,16], index: 4, kind: output, shape index: {}]  }
   0x1   :  { %s670_s17 = smov 0  }
   0x2 LB: > { %s26_s18 = sadd.s32 1, %s633_s16  ;;  %p553_p0 = scmp.ge.s32.totalorder %s637_s17, 1  ;;  %s637_s17 = sphi %s670_s17, %s14_s17   ;;  %s633_s16 = sphi %s668_s16, %s721_s16   ;;  %s629_s15 = sphi %s666_s15, %s720_s15  }
   0x3   : > { %p28_p1 = scmp.ge.s32.totalorder %s26_s18, 2  ;;  %p180_p2 = scmp.lt.s32.totalorder %s637_s17, 3 }
   0x5   : > { %s723_s18 = smov (%p28_p1, %s26_s18), 0  ;;  %p181_p3 = pnand %p553_p0, %p180_p2 }
   0x6   : > { %p210_p4 = scmp.lt.s32.totalorder (!%p181_p3), %s629_s15, 1  ;;  %v639_v0 = vmov (!%p181_p3), 0.0   ;;  %vm640_vm0 = vmmov (!%p181_p3), 0   ;;  %vm232_vm1 = vcmask (!%p181_p3), 1045504   ;;  %v224_v1 = vld [vmem:[%s716_s1] sm:$0x3f] (!%p181_p3) }
   0x7   : > { %184 = sbr.rel (%p181_p3) target bundleno = 692 (0x2b4), region = 36  ;;  %570 = vmatprep.subr.mxu0 (!%p181_p3), %v639_v0  ;;  %572 = vmatprep.mubr.msk.f32.mxu0 (!%p181_p3), %vm640_vm0, %v639_v0  ;;  %vm228_vm2 = vcmask (!%p181_p3), 48128   ;;  %v225_v7 = vld [vmem:[%s717_s2] sm:$0x7] (!%p181_p3)  ;;  %vm398_vm5 = vcmask (!%p181_p3), 1042432   ;;  %vm394_vm6 = vcmask (!%p181_p3), 23552  }
   0x8   : > { %575 = vmatprep.subr.mxu1 (!%p181_p3), %v639_v0  ;;  %577 = vmatprep.mubr.msk.f32.mxu1 (!%p181_p3), %vm640_vm0, %v639_v0  ;;  %v226_v16 = vld [vmem:[%s718_s3] sm:$0x3f] (!%p181_p3)  ;;  %vm473_vm7 = vcmask (!%p181_p3), 128000  }
   0xe   : > { %s725_s15 = smov (!%p210_p4, %s629_s15), 1 }
   0xf   : > { %s554_s19 = sshll.u32 %s725_s15, 3 }
  0x10   : > { %s216_s22 = scalar_lea.vmem %s715_s0, %s554_s19  ;;  %s223_s5 = scalar_lea.vmem %s719_s4, %s554_s19 }
  0x11   : > { %v227_v2 = vld [vmem:[%s216_s22] sm:$0x3f] }
  0x12   : > { %571 = vmatpush3.msk.msra.mxu0 %vm232_vm1, %v227_v2 }
  0x13   : > { %573 = vmatmul.mubr.msk.f32.vlgmr.msra.gmra.mrb[0].mxu0 %vm228_vm2, %v224_v1  ;;  %580 = vmatprep.subr.mxu0 %v639_v0 }
  0x14   : > { %582 = vmatprep.mubr.msk.f32.mxu0 %vm640_vm0, %v639_v0 }
  0xe6   : > { %v302_v3 = vpop.f32.mrb[0].mxu0 }
  0xe7   : > { %v306_v4 = vsub.f32 %v227_v2, %v302_v3  ;;  %v574_v5 = vpop.f32.mrb[1].mxu0 }
  0xe9   : > { %v307_v6 = vmul.f32 %v306_v4, %v306_v4 }
  0xeb   : > { %576 = vmatpush3.msk.msra.mxu1 %vm232_vm1, %v307_v6 }
  0xec   : > { %578 = vmatmul.mubr.msk.f32.vlgmr.msra.gmra.mrb[0].mxu1 %vm228_vm2, %v225_v7 }
 0x1bf   : > { %v380_v8 = vpop.f32.mrb[0].mxu1 }
 0x1c0   : > { %611 = vrsqrt.f32 %v380_v8  ;;  %v579_v9 = vpop.f32.mrb[1].mxu1  ;;  %vm386_vm3 = vcmp.eq.f32.partialorder %v380_v8, inf  ;;  %v389_v12 = vand.u32 2147483648, %v380_v8  ;;  %vm388_vm4 = vcmp.eq.f32.partialorder %v380_v8, 0.0 }
 0x1ca   : > { %v612_v10 = vpop.eup %611 }
 0x1cb   : > { %v385_v11 = vmul.f32 %v612_v10, %v380_v8 }
 0x1cd   : > { %v387_v13 = vsel %vm386_vm3, %v380_v8, %v385_v11 }
 0x1ce   : > { %v390_v14 = vsel %vm388_vm4, %v389_v12, %v387_v13 }
 0x1cf   : > { %v391_v15 = vadd.f32 0.0001, %v390_v14 }
 0x1d1   : > { %613 = vrcp.f32 %v391_v15 }
 0x1db   : > { %v614_v17 = vpop.eup %613 }
 0x1dc   : > { %581 = vmatpush3.msk.msra.mxu0 %vm398_vm5, %v614_v17 }
 0x1dd   : > { %583 = vmatmul.mubr.msk.f32.vlgmr.msra.gmra.mrb[2].mxu0 %vm394_vm6, %v226_v16 }
 0x2b0   : > { %v468_v18 = vpop.f32.mrb[2].mxu0 }
 0x2b1   : > { %v472_v19 = vmul.f32 %v468_v18, %v306_v4  ;;  %v584_v20 = vpop.f32.mrb[3].mxu0 }
 0x2b3   : > { %474 = vst.msk [vmem:[%s223_s5] sm:$0x3f] %vm473_vm7, %v472_v19 }
 0x2b4 PF: > { %s14_s17 = sadd.s32 1, %s637_s17   ;;  %s720_s15 = smov %s633_s16 }
 0x2b5   : > { %p11_p5 = scmp.ge.s32.totalorder %s14_s17, 4   ;;  %s721_s16 = smov %s723_s18 }
 0x2b7   :  { %13 = sbr.rel (!%p11_p5) target bundleno = 2 (0x2), region = 66 }

</bundles_post_ra>
